<compile_context>
chip_gen: v5e
topology: v5e:2x2
jax: 0.10.0
libtpu: 0.0.40
codegen_flags: <defaults>
</compile_context>

<pallas_src>
import functools

import jax
import jax.numpy as jnp
from jax.experimental import pallas as pl
from jax.experimental.pallas import tpu as pltpu


LANE = 128       # pad feature dims to full lane width (dense stores, full vregs)
SUBLANE = 16     # batch tiles kept as multiples of 16 (covers bf16 sublane packing)


def _round_up(n, m):
    return pl.cdiv(n, m) * m


def mlp_kernel(x_ref, w0_ref, b0_ref, w1_ref, b1_ref, w2_ref, b2_ref, o_ref,
               *, elem_dtype):
    """3-layer MLP (tanh, tanh, identity). bf16 MXU matmuls with f32 accumulation;
    bias-add + tanh in `elem_dtype` (bf16 on v6e/v7x, f32 on v5e)."""
    # x arrives f32 straight from HBM; cast to bf16 in-kernel (free VPU work).
    x = x_ref[...].astype(jnp.bfloat16)

    # Layer 0: Linear(indim -> hidden0 padded to 128) + tanh
    h = jnp.dot(x, w0_ref[...], preferred_element_type=jnp.float32)
    h = jnp.tanh(h.astype(elem_dtype) + b0_ref[...].astype(elem_dtype))

    # Layer 1: Linear(hidden0 -> hidden1) + tanh
    h = jnp.dot(h.astype(jnp.bfloat16), w1_ref[...],
                preferred_element_type=jnp.float32)
    h = jnp.tanh(h.astype(elem_dtype) + b1_ref[...].astype(elem_dtype))

    # Layer 2: Linear(hidden1 -> outdim padded to 128) + identity (bias add in f32)
    o = jnp.dot(h.astype(jnp.bfloat16), w2_ref[...],
                preferred_element_type=jnp.float32)
    o_ref[...] = (o + b2_ref[...]).astype(o_ref.dtype)   # bf16, lane-dense (tb, 128)


def _elementwise_dtype():
    """bf16 bias/tanh only where the VPU/EUP have bf16 paths (v6e / v7x)."""
    try:
        kind = jax.devices()[0].device_kind.lower()
    except Exception:
        return jnp.float32
    if "v6" in kind or "v7" in kind or "7x" in kind:
        return jnp.bfloat16
    return jnp.float32   # v5e and older: no bf16 VPU/EUP -> keep f32 elementwise


def neuralnet_forward(x, packed_params, outdim, *, block_b=1024):
    """x: (B, indim) f32.  packed_params: 3x (W bf16 (in, out_pad), b f32 (1, out_pad)).
    Returns (B, outdim) f32."""
    (w0, b0), (w1, b1), (w2, b2) = packed_params
    B, indim = x.shape
    out_pad = w2.shape[1]

    # Batch tile: multiple of 16, capped by block_b.  When B fits in <= 2 blocks,
    # split so the grid has >= 2 steps and v7x's two TensorCores both get work;
    # for large B, tb == block_b (512-1024 reaches ~85% of the HBM roofline).
    tb = int(min(block_b, SUBLANE * pl.cdiv(pl.cdiv(B, 2), SUBLANE)))
    tb = max(tb, SUBLANE)
    grid = (pl.cdiv(B, tb),)   # partial edge block handled by Pallas masked stores

    kernel = functools.partial(mlp_kernel, elem_dtype=_elementwise_dtype())

    def build(resident_pipeline):
        kw = {} if resident_pipeline is None else {"pipeline_mode": resident_pipeline}
        resident = lambda i: (0, 0)   # same block every step -> stays VMEM-resident
        return pl.pallas_call(
            kernel,
            # bf16 output halves the dominant HBM write stream.
            out_shape=jax.ShapeDtypeStruct((B, out_pad), jnp.bfloat16),
            grid=grid,
            in_specs=[
                pl.BlockSpec((tb, indim), lambda i: (i, 0)),  # x streams over batch
                pl.BlockSpec(w0.shape, resident, **kw),
                pl.BlockSpec(b0.shape, resident, **kw),
                pl.BlockSpec(w1.shape, resident, **kw),
                pl.BlockSpec(b1.shape, resident, **kw),
                pl.BlockSpec(w2.shape, resident, **kw),
                pl.BlockSpec(b2.shape, resident, **kw),
            ],
            out_specs=pl.BlockSpec((tb, out_pad), lambda i: (i, 0)),
            compiler_params=pltpu.CompilerParams(
                dimension_semantics=("parallel",),   # shard batch steps across TCs (v7x)
                # VMEM is not the binding constraint on any generation (working set is
                # a few MB even at tb=2048); this is just a generous scoped ceiling.
                vmem_limit_bytes=32 * 1024 * 1024,
            ),
        )

    args = (x, w0, b0, w1, b1, w2, b2)
    try:
        # Resident weights/biases never change block index -> single-buffer them
        # (drops the redundant second buffer and its prologue DMA).
        out = build(pl.Buffered(1))(*args)
    except Exception:
        # Fallback for jax versions that reject single-buffered resident blocks.
        out = build(None)(*args)

    # Slice away lane padding and restore the module's f32 dtype for callers.
    return out[:, :outdim].astype(jnp.float32)


def xavier_uniform(key, fan_in, fan_out):
    bound = jnp.sqrt(6.0 / (fan_in + fan_out))
    # stored as (in, out) = transpose of torch's (out, in); same init distribution
    return jax.random.uniform(
        key, (fan_in, fan_out), dtype=jnp.float32, minval=-bound, maxval=bound
    )


def init_params(key, indim, layers, outdim):
    """Unpadded f32 parameters, matching torch's xavier_uniform_ / zeros_ init."""
    dims = [indim] + list(layers) + [outdim]
    params = []
    for i in range(len(dims) - 1):
        key, sub = jax.random.split(key)
        w = xavier_uniform(sub, dims[i], dims[i + 1])
        b = jnp.zeros((1, dims[i + 1]), dtype=jnp.float32)  # nn.init.zeros_
        params.append((w, b))
    return params


def pack_params(params, indim):
    """Zero-pad output feature dims to multiples of 128 (lane-dense) and cast W to bf16.

    indim stays unpadded: layer-0 FLOPs are negligible and padding x to 128 lanes
    would 4x its HBM bytes for zero benefit.  Padding is exact: zero weight
    rows/cols + zero bias + tanh(0)=0 keep padded lanes inert.
    """
    packed = []
    prev_in = indim
    for w, b in params:
        fin, fout = w.shape
        fout_p = int(max(LANE, _round_up(fout, LANE)))
        wp = jnp.zeros((prev_in, fout_p), jnp.float32).at[:fin, :fout].set(w)
        bp = jnp.zeros((1, fout_p), jnp.float32).at[:, :fout].set(b)
        packed.append((wp.astype(jnp.bfloat16), bp))   # weights bf16, biases f32
        prev_in = fout_p
    return packed


def reference_forward(x, params):
    """Pure-JAX f32 reference of the torch forward (tanh, tanh, identity)."""
    acts = [jnp.tanh, jnp.tanh, lambda z: z]
    h = x
    for (w, b), act in zip(params, acts):
        h = act(h @ w + b)
    return h


if __name__ == "__main__":
    indim, layers, outdim = 32, [64, 128], 16
    batch = 48

    key = jax.random.PRNGKey(0)
    key, kx = jax.random.split(key)
    x = jax.random.normal(kx, (batch, indim), dtype=jnp.float32)
    params = init_params(key, indim, layers, outdim)
    packed = pack_params(params, indim)

    fwd = functools.partial(neuralnet_forward, outdim=outdim)  # tb=32 -> grid=(2,)

    out = jax.block_until_ready(fwd(x, packed))
    ref = reference_forward(x, params)
    assert out.shape == (batch, outdim)
    assert out.dtype == jnp.float32
    # bf16 matmuls + bf16 output store -> compare against f32 ref at bf16 tolerance
    assert jnp.allclose(out, ref, atol=5e-2, rtol=5e-2), "mismatch vs reference"

    # Batch that doesn't divide the tile: exercises Pallas's masked edge block.
    x2 = x[:40]
    out2 = jax.block_until_ready(fwd(x2, packed))
    assert out2.shape == (40, outdim)
    assert jnp.allclose(out2, ref[:40], atol=5e-2, rtol=5e-2), "mismatch (edge block)"

    print("KERNEL_OK")
</pallas_src>

<mosaic_0001>
module attributes {stable_mosaic.version = 11 : i64} {
  func.func @mlp_kernel(%arg0: i32, %arg1: memref<32x32xf32, #tpu.memory_space<vmem>>, %arg2: memref<32x128xbf16, #tpu.memory_space<vmem>>, %arg3: memref<1x128xf32, #tpu.memory_space<vmem>>, %arg4: memref<128x128xbf16, #tpu.memory_space<vmem>>, %arg5: memref<1x128xf32, #tpu.memory_space<vmem>>, %arg6: memref<128x128xbf16, #tpu.memory_space<vmem>>, %arg7: memref<1x128xf32, #tpu.memory_space<vmem>>, %arg8: memref<32x128xbf16, #tpu.memory_space<vmem>>) attributes {dimension_semantics = [#tpu.dimension_semantics<parallel>], iteration_bounds = array<i64: 2>, scalar_prefetch = 0 : i64, scratch_operands = 0 : i64, tpu.core_type = #tpu.core_type<tc>, window_params = [{transform_indices = @transform_0, window_bounds = array<i64: 32, 32>}, {pipeline_mode = #tpu.pipeline_mode<synchronous>, transform_indices = @transform_1, window_bounds = array<i64: 32, 128>}, {pipeline_mode = #tpu.pipeline_mode<synchronous>, transform_indices = @transform_2, window_bounds = array<i64: 1, 128>}, {pipeline_mode = #tpu.pipeline_mode<synchronous>, transform_indices = @transform_3, window_bounds = array<i64: 128, 128>}, {pipeline_mode = #tpu.pipeline_mode<synchronous>, transform_indices = @transform_4, window_bounds = array<i64: 1, 128>}, {pipeline_mode = #tpu.pipeline_mode<synchronous>, transform_indices = @transform_5, window_bounds = array<i64: 128, 128>}, {pipeline_mode = #tpu.pipeline_mode<synchronous>, transform_indices = @transform_6, window_bounds = array<i64: 1, 128>}, {transform_indices = @transform_7, window_bounds = array<i64: 32, 128>}]} {
    %c0 = arith.constant 0 : index
    %c0_0 = arith.constant 0 : index
    %0 = vector.load %arg1[%c0, %c0_0] : memref<32x32xf32, #tpu.memory_space<vmem>>, vector<32x32xf32>
    %1 = arith.truncf %0 : vector<32x32xf32> to vector<32x32xbf16>
    %c0_1 = arith.constant 0 : index
    %c0_2 = arith.constant 0 : index
    %2 = vector.load %arg2[%c0_1, %c0_2] : memref<32x128xbf16, #tpu.memory_space<vmem>>, vector<32x128xbf16>
    %cst = arith.constant dense<0.000000e+00> : vector<32x128xf32>
    %3 = tpu.matmul %1, %2, %cst {dimension_numbers = #tpu.dot_dimension_numbers<[1], [0], [0], [1], [0, 0, 1, 1], [], []>} : vector<32x32xbf16>, vector<32x128xbf16>, vector<32x128xf32> -> vector<32x128xf32>
    %c0_3 = arith.constant 0 : index
    %c0_4 = arith.constant 0 : index
    %4 = vector.load %arg3[%c0_3, %c0_4] : memref<1x128xf32, #tpu.memory_space<vmem>>, vector<1x128xf32>
    %5 = vector.broadcast %4 : vector<1x128xf32> to vector<32x128xf32>
    %6 = arith.addf %3, %5 : vector<32x128xf32>
    %7 = math.tanh %6 : vector<32x128xf32>
    %8 = arith.truncf %7 : vector<32x128xf32> to vector<32x128xbf16>
    %c0_5 = arith.constant 0 : index
    %c0_6 = arith.constant 0 : index
    %9 = vector.load %arg4[%c0_5, %c0_6] : memref<128x128xbf16, #tpu.memory_space<vmem>>, vector<128x128xbf16>
    %cst_7 = arith.constant dense<0.000000e+00> : vector<32x128xf32>
    %10 = tpu.matmul %8, %9, %cst_7 {dimension_numbers = #tpu.dot_dimension_numbers<[1], [0], [0], [1], [0, 0, 1, 1], [], []>} : vector<32x128xbf16>, vector<128x128xbf16>, vector<32x128xf32> -> vector<32x128xf32>
    %c0_8 = arith.constant 0 : index
    %c0_9 = arith.constant 0 : index
    %11 = vector.load %arg5[%c0_8, %c0_9] : memref<1x128xf32, #tpu.memory_space<vmem>>, vector<1x128xf32>
    %12 = vector.broadcast %11 : vector<1x128xf32> to vector<32x128xf32>
    %13 = arith.addf %10, %12 : vector<32x128xf32>
    %14 = math.tanh %13 : vector<32x128xf32>
    %15 = arith.truncf %14 : vector<32x128xf32> to vector<32x128xbf16>
    %c0_10 = arith.constant 0 : index
    %c0_11 = arith.constant 0 : index
    %16 = vector.load %arg6[%c0_10, %c0_11] : memref<128x128xbf16, #tpu.memory_space<vmem>>, vector<128x128xbf16>
    %cst_12 = arith.constant dense<0.000000e+00> : vector<32x128xf32>
    %17 = tpu.matmul %15, %16, %cst_12 {dimension_numbers = #tpu.dot_dimension_numbers<[1], [0], [0], [1], [0, 0, 1, 1], [], []>} : vector<32x128xbf16>, vector<128x128xbf16>, vector<32x128xf32> -> vector<32x128xf32>
    %c0_13 = arith.constant 0 : index
    %c0_14 = arith.constant 0 : index
    %18 = vector.load %arg7[%c0_13, %c0_14] : memref<1x128xf32, #tpu.memory_space<vmem>>, vector<1x128xf32>
    %19 = vector.broadcast %18 : vector<1x128xf32> to vector<32x128xf32>
    %20 = arith.addf %17, %19 : vector<32x128xf32>
    %21 = arith.truncf %20 : vector<32x128xf32> to vector<32x128xbf16>
    %c0_15 = arith.constant 0 : index
    %c0_16 = arith.constant 0 : index
    %22 = vector.load %arg8[%c0_15, %c0_16] : memref<32x128xbf16, #tpu.memory_space<vmem>>, vector<32x128xbf16>
    tpu.vector_store %arg8[%c0_15, %c0_16], %21 {strides = array<i32>} : memref<32x128xbf16, #tpu.memory_space<vmem>>, vector<32x128xbf16>,
    return
  }
  func.func @transform_0(%arg0: i32) -> (i32, i32) {
    %c0_i32 = arith.constant 0 : i32
    %c0_i32_0 = arith.constant 0 : i32
    return %arg0, %c0_i32 : i32, i32
  }
  func.func @transform_1(%arg0: i32) -> (i32, i32) {
    %c0_i32 = arith.constant 0 : i32
    %c0_i32_0 = arith.constant 0 : i32
    %c0_i32_1 = arith.constant 0 : i32
    return %c0_i32, %c0_i32_0 : i32, i32
  }
  func.func @transform_2(%arg0: i32) -> (i32, i32) {
    %c0_i32 = arith.constant 0 : i32
    %c0_i32_0 = arith.constant 0 : i32
    %c0_i32_1 = arith.constant 0 : i32
    return %c0_i32, %c0_i32_0 : i32, i32
  }
  func.func @transform_3(%arg0: i32) -> (i32, i32) {
    %c0_i32 = arith.constant 0 : i32
    %c0_i32_0 = arith.constant 0 : i32
    %c0_i32_1 = arith.constant 0 : i32
    return %c0_i32, %c0_i32_0 : i32, i32
  }
  func.func @transform_4(%arg0: i32) -> (i32, i32) {
    %c0_i32 = arith.constant 0 : i32
    %c0_i32_0 = arith.constant 0 : i32
    %c0_i32_1 = arith.constant 0 : i32
    return %c0_i32, %c0_i32_0 : i32, i32
  }
  func.func @transform_5(%arg0: i32) -> (i32, i32) {
    %c0_i32 = arith.constant 0 : i32
    %c0_i32_0 = arith.constant 0 : i32
    %c0_i32_1 = arith.constant 0 : i32
    return %c0_i32, %c0_i32_0 : i32, i32
  }
  func.func @transform_6(%arg0: i32) -> (i32, i32) {
    %c0_i32 = arith.constant 0 : i32
    %c0_i32_0 = arith.constant 0 : i32
    %c0_i32_1 = arith.constant 0 : i32
    return %c0_i32, %c0_i32_0 : i32, i32
  }
  func.func @transform_7(%arg0: i32) -> (i32, i32) {
    %c0_i32 = arith.constant 0 : i32
    %c0_i32_0 = arith.constant 0 : i32
    return %arg0, %c0_i32 : i32, i32
  }
}

module attributes {stable_mosaic.version = 11 : i64} {
  func.func @mlp_kernel(%arg0: i32, %arg1: memref<32x32xf32, #tpu.memory_space<vmem>>, %arg2: memref<32x128xbf16, #tpu.memory_space<vmem>>, %arg3: memref<1x128xf32, #tpu.memory_space<vmem>>, %arg4: memref<128x128xbf16, #tpu.memory_space<vmem>>, %arg5: memref<1x128xf32, #tpu.memory_space<vmem>>, %arg6: memref<128x128xbf16, #tpu.memory_space<vmem>>, %arg7: memref<1x128xf32, #tpu.memory_space<vmem>>, %arg8: memref<32x128xbf16, #tpu.memory_space<vmem>>) attributes {dimension_semantics = [#tpu.dimension_semantics<parallel>], iteration_bounds = array<i64: 2>, scalar_prefetch = 0 : i64, scratch_operands = 0 : i64, tpu.core_type = #tpu.core_type<tc>, window_params = [{transform_indices = @transform_0, window_bounds = array<i64: 32, 32>}, {pipeline_mode = #tpu.pipeline_mode<synchronous>, transform_indices = @transform_1, window_bounds = array<i64: 32, 128>}, {pipeline_mode = #tpu.pipeline_mode<synchronous>, transform_indices = @transform_2, window_bounds = array<i64: 1, 128>}, {pipeline_mode = #tpu.pipeline_mode<synchronous>, transform_indices = @transform_3, window_bounds = array<i64: 128, 128>}, {pipeline_mode = #tpu.pipeline_mode<synchronous>, transform_indices = @transform_4, window_bounds = array<i64: 1, 128>}, {pipeline_mode = #tpu.pipeline_mode<synchronous>, transform_indices = @transform_5, window_bounds = array<i64: 128, 128>}, {pipeline_mode = #tpu.pipeline_mode<synchronous>, transform_indices = @transform_6, window_bounds = array<i64: 1, 128>}, {transform_indices = @transform_7, window_bounds = array<i64: 32, 128>}]} {
    %c0 = arith.constant 0 : index
    %c0_0 = arith.constant 0 : index
    %0 = vector.load %arg1[%c0, %c0_0] : memref<32x32xf32, #tpu.memory_space<vmem>>, vector<32x32xf32>
    %1 = arith.truncf %0 : vector<32x32xf32> to vector<32x32xbf16>
    %c0_1 = arith.constant 0 : index
    %c0_2 = arith.constant 0 : index
    %2 = vector.load %arg2[%c0_1, %c0_2] : memref<32x128xbf16, #tpu.memory_space<vmem>>, vector<32x128xbf16>
    %cst = arith.constant dense<0.000000e+00> : vector<32x128xf32>
    %3 = tpu.matmul %1, %2, %cst {dimension_numbers = #tpu.dot_dimension_numbers<[1], [0], [0], [1], [0, 0, 1, 1], [], []>} : vector<32x32xbf16>, vector<32x128xbf16>, vector<32x128xf32> -> vector<32x128xf32>
    %c0_3 = arith.constant 0 : index
    %c0_4 = arith.constant 0 : index
    %4 = vector.load %arg3[%c0_3, %c0_4] : memref<1x128xf32, #tpu.memory_space<vmem>>, vector<1x128xf32>
    %5 = vector.broadcast %4 : vector<1x128xf32> to vector<32x128xf32>
    %6 = arith.addf %3, %5 : vector<32x128xf32>
    %7 = math.tanh %6 : vector<32x128xf32>
    %8 = arith.truncf %7 : vector<32x128xf32> to vector<32x128xbf16>
    %c0_5 = arith.constant 0 : index
    %c0_6 = arith.constant 0 : index
    %9 = vector.load %arg4[%c0_5, %c0_6] : memref<128x128xbf16, #tpu.memory_space<vmem>>, vector<128x128xbf16>
    %cst_7 = arith.constant dense<0.000000e+00> : vector<32x128xf32>
    %10 = tpu.matmul %8, %9, %cst_7 {dimension_numbers = #tpu.dot_dimension_numbers<[1], [0], [0], [1], [0, 0, 1, 1], [], []>} : vector<32x128xbf16>, vector<128x128xbf16>, vector<32x128xf32> -> vector<32x128xf32>
    %c0_8 = arith.constant 0 : index
    %c0_9 = arith.constant 0 : index
    %11 = vector.load %arg5[%c0_8, %c0_9] : memref<1x128xf32, #tpu.memory_space<vmem>>, vector<1x128xf32>
    %12 = vector.broadcast %11 : vector<1x128xf32> to vector<32x128xf32>
    %13 = arith.addf %10, %12 : vector<32x128xf32>
    %14 = math.tanh %13 : vector<32x128xf32>
    %15 = arith.truncf %14 : vector<32x128xf32> to vector<32x128xbf16>
    %c0_10 = arith.constant 0 : index
    %c0_11 = arith.constant 0 : index
    %16 = vector.load %arg6[%c0_10, %c0_11] : memref<128x128xbf16, #tpu.memory_space<vmem>>, vector<128x128xbf16>
    %cst_12 = arith.constant dense<0.000000e+00> : vector<32x128xf32>
    %17 = tpu.matmul %15, %16, %cst_12 {dimension_numbers = #tpu.dot_dimension_numbers<[1], [0], [0], [1], [0, 0, 1, 1], [], []>} : vector<32x128xbf16>, vector<128x128xbf16>, vector<32x128xf32> -> vector<32x128xf32>
    %c0_13 = arith.constant 0 : index
    %c0_14 = arith.constant 0 : index
    %18 = vector.load %arg7[%c0_13, %c0_14] : memref<1x128xf32, #tpu.memory_space<vmem>>, vector<1x128xf32>
    %19 = vector.broadcast %18 : vector<1x128xf32> to vector<32x128xf32>
    %20 = arith.addf %17, %19 : vector<32x128xf32>
    %21 = arith.truncf %20 : vector<32x128xf32> to vector<32x128xbf16>
    %c0_15 = arith.constant 0 : index
    %c0_16 = arith.constant 0 : index
    %22 = vector.load %arg8[%c0_15, %c0_16] : memref<32x128xbf16, #tpu.memory_space<vmem>>, vector<32x128xbf16>
    tpu.vector_store %arg8[%c0_15, %c0_16], %21 {strides = array<i32>} : memref<32x128xbf16, #tpu.memory_space<vmem>>, vector<32x128xbf16>,
    return
  }
  func.func @transform_0(%arg0: i32) -> (i32, i32) {
    %c0_i32 = arith.constant 0 : i32
    %c0_i32_0 = arith.constant 0 : i32
    return %arg0, %c0_i32 : i32, i32
  }
  func.func @transform_1(%arg0: i32) -> (i32, i32) {
    %c0_i32 = arith.constant 0 : i32
    %c0_i32_0 = arith.constant 0 : i32
    %c0_i32_1 = arith.constant 0 : i32
    return %c0_i32, %c0_i32_0 : i32, i32
  }
  func.func @transform_2(%arg0: i32) -> (i32, i32) {
    %c0_i32 = arith.constant 0 : i32
    %c0_i32_0 = arith.constant 0 : i32
    %c0_i32_1 = arith.constant 0 : i32
    return %c0_i32, %c0_i32_0 : i32, i32
  }
  func.func @transform_3(%arg0: i32) -> (i32, i32) {
    %c0_i32 = arith.constant 0 : i32
    %c0_i32_0 = arith.constant 0 : i32
    %c0_i32_1 = arith.constant 0 : i32
    return %c0_i32, %c0_i32_0 : i32, i32
  }
  func.func @transform_4(%arg0: i32) -> (i32, i32) {
    %c0_i32 = arith.constant 0 : i32
    %c0_i32_0 = arith.constant 0 : i32
    %c0_i32_1 = arith.constant 0 : i32
    return %c0_i32, %c0_i32_0 : i32, i32
  }
  func.func @transform_5(%arg0: i32) -> (i32, i32) {
    %c0_i32 = arith.constant 0 : i32
    %c0_i32_0 = arith.constant 0 : i32
    %c0_i32_1 = arith.constant 0 : i32
    return %c0_i32, %c0_i32_0 : i32, i32
  }
  func.func @transform_6(%arg0: i32) -> (i32, i32) {
    %c0_i32 = arith.constant 0 : i32
    %c0_i32_0 = arith.constant 0 : i32
    %c0_i32_1 = arith.constant 0 : i32
    return %c0_i32, %c0_i32_0 : i32, i32
  }
  func.func @transform_7(%arg0: i32) -> (i32, i32) {
    %c0_i32 = arith.constant 0 : i32
    %c0_i32_0 = arith.constant 0 : i32
    return %arg0, %c0_i32 : i32, i32
  }
}

</mosaic_0001>

<bundles_post_ra>
// kernel: tpu_custom_call.1
= control target key start
LH: loop header
LB: loop body
LE: loop exit
PB: predicated region body
PF: predicated region fallthrough
CT: control target
= control target key end

     0   :  { %12 = vsyncpa [#allocation3], 0  ;;  %s1196_s0 = inlined_call_operand.vmem [shape: f32[48,32], index: 0, kind: input, shape index: {}]   ;;  %s1197_s1 = inlined_call_operand.vmem [shape: bf16[32,128], index: 1, kind: input, shape index: {}]   ;;  %s1198_s2 = inlined_call_operand.vmem [shape: f32[1,128], index: 2, kind: input, shape index: {}]   ;;  %s1199_s3 = inlined_call_operand.vmem [shape: bf16[128,128], index: 3, kind: input, shape index: {}]   ;;  %s1200_s4 = inlined_call_operand.vmem [shape: f32[1,128], index: 4, kind: input, shape index: {}]   ;;  %s1201_s5 = inlined_call_operand.hbm [shape: bf16[128,128], index: 5, kind: input, shape index: {}]   ;;  %s1202_s6 = inlined_call_operand.vmem [shape: f32[1,128], index: 6, kind: input, shape index: {}]   ;;  %s1203_s7 = inlined_call_operand.hbm [shape: bf16[48,128], index: 7, kind: output, shape index: {}]  }
   0x1   :  { %13 = vsyncpa [#allocation4], 0 }
   0x2   :  { %15 = vsyncpa [#allocation4 + $0x1], 0  ;;  %s1030_s24 = smov 0   ;;  %s1032_s25 = smov 0  }
   0x3   :  { %s1034_s26 = smov 0   ;;  %s1036_s27 = smov 0  }
   0x4 LB: > { %s1051_s28 = sadd.s32 4294967295, %s982_s27   ;;  %s665_s29 = sadd.s32 4294967294, %s982_s27   ;;  %s982_s27 = sphi %s1036_s27, %s1212_s27   ;;  %s978_s26 = sphi %s1034_s26, %s1211_s26   ;;  %s974_s25 = sphi %s1032_s25, %s1210_s25   ;;  %s970_s24 = sphi %s1030_s24, %s1209_s24  }
   0x5   : > { %s1055_s30 = sadd.s32 1, %s982_s27   ;;  %s180_s8 = sadd.s32 1, %s978_s26 }
   0x6   : > { %s177_s9 = ssub.s32 %s982_s27, %s1055_s30  ;;  %p190_p0 = scmp.ne.s32.totalorder %s978_s26, %s974_s25 }
   0x7   : > { %p178_p1 = scmp.eq.s32.totalorder %s177_s9, 0  ;;  %p191_p2 = scmp.eq.s32.totalorder %s1051_s28, 1 }
   0x8   : > { %p196_p3 = scmp.ne.s32.totalorder %s974_s25, %s970_s24  ;;  %p197_p4 = scmp.eq.s32.totalorder %s665_s29, 1 }
   0x9   : > { %s1066_s10 = scalar_select %p178_p1, %s978_s26, %s180_s8  }
   0xa   : > { %p1068_p5 = por %p191_p2, %p190_p0  ;;  %p1072_p6 = por %p197_p4, %p196_p3 }
   0xb   : > { %p666_p7 = scmp.ge.s32.totalorder %s982_s27, 1  ;;  %p204_p8 = scmp.lt.s32.totalorder %s982_s27, 3 }
   0xc   : > { %p816_p9 = scmp.eq.s32.totalorder %s1051_s28, 0  ;;  %s227_s15 = sshll.u32 %s1201_s5, 4  ;;  %s228_s15 = int_to_ptr.hbm [resolvable:$true] %s227_s15 }
   0xd   : > { %p205_p10 = pnand %p666_p7, %p204_p8  ;;  %s984_s16 = smov [#allocation2]  }
   0xe   : > { %s229_s17 = sshll.u32 %s984_s16, 4  ;;  %s985_s18 = smov 64   ;;  %s230_s17 = int_to_ptr.vmem [resolvable:$true] %s229_s17 }
   0xf   : > { %p808_p11 = pneg %p205_p10  ;;  %s986_s19 = smov 4  }
  0x10   : > { %265 = sbr.rel (%p205_p10) target bundleno = 521 (0x209), region = 48 }
  0x11   : > { %p809_p12 = pnand %p816_p9, %p808_p11 }
  0x13   : > { %811 = dma.hbm_to_vmem [thread:$0]  (!%p809_p12), %s228_s15, 1024, %s230_s17, [#allocation3], %s985_s18, %s985_s18, %s986_s19  }
  0x15   : > { %961 = dma.done.wait (%p816_p9), [#allocation3], 1024  }
  0x16   : > { %963 = vsyncadd (%p816_p9), [#allocation3], 4294966272  ;;  %s1089_s20 = sshll.u32 %s1051_s28, 2  ;;  %v758_v0 = vld [vmem:[%s1197_s1 + $0x8] sm:$0xff]  ;;  %v757_v1 = vld [vmem:[%s1197_s1] sm:$0xff]  ;;  %vm348_vm0 = vcmask 261120  }
  0x17   : > { %p307_p13 = scmp.lt.s32.totalorder %s1089_s20, 5  ;;  %361 = vmatpush.bf16.msra.mxu0 %v758_v0  ;;  %v766_v4 = vld [vmem:[%s1199_s3 + $0x38] sm:$0xff]  ;;  %v765_v5 = vld [vmem:[%s1199_s3 + $0x30] sm:$0xff]  ;;  %v764_v7 = vld [vmem:[%s1199_s3 + $0x28] sm:$0xff]  ;;  %s299_s29 = sand.u32 1, %s974_s25  }
  0x18   : > { %448 = vmatpush.bf16.msra.mxu1 %v766_v4  ;;  %787 = vmatpush.bf16.msra.mxu3 %v766_v4  ;;  %v763_v11 = vld [vmem:[%s1199_s3 + $0x20] sm:$0xff]  ;;  %v762_v12 = vld [vmem:[%s1199_s3 + $0x18] sm:$0xff]  ;;  %v761_v13 = vld [vmem:[%s1199_s3 + $0x10] sm:$0xff]  ;;  %s671_s14 = sshll.u32 %s299_s29, 4  ;;  %s577_s16 = ssub.s32 (%p1068_p5), 6, %s1089_s20 }
  0x19   : > { %s308_s21 = scalar_select %p307_p13, %s1089_s20, 5  ;;  %v760_v14 = vld [vmem:[%s1199_s3 + $0x8] sm:$0xff]  ;;  %v759_v15 = vld [vmem:[%s1199_s3] sm:$0xff]  ;;  %v774_v18 = vld [vmem:[#allocation2 + $0x38] sm:$0xff] }
  0x1a   : > { %v856_v17 = vld [vmem:[%s1198_s2] ss:$0 sm:$0xff]  ;;  %v773_v20 = vld [vmem:[#allocation2 + $0x30] sm:$0xff]  ;;  %795 = vmatpush.bf16.msra.mxu2 %v774_v18  ;;  %v772_v23 = vld [vmem:[#allocation2 + $0x28] sm:$0xff]  ;;  %s301_s15 = scalar_lea.vmem [#allocation5], %s671_s14  ;;  %p578_p0 = scmp.lt.s32.totalorder (%p1068_p5), %s577_s16, 4 }
  0x1b   : > { %s673_s22 = sshll.u32 %s308_s21, 3  ;;  %362 = vmatpush.bf16.msra.mxu0 %v757_v1  ;;  %v771_v34 = vld [vmem:[#allocation2 + $0x20] sm:$0xff]  ;;  %v770_v35 = vld [vmem:[#allocation2 + $0x18] sm:$0xff]  ;;  %v769_v36 = vld [vmem:[#allocation2 + $0x10] sm:$0xff] }
  0x1c   : > { %s310_s8 = scalar_lea.vmem %s1196_s0, %s673_s22  ;;  %449 = vmatpush.bf16.msra.mxu1 %v765_v5  ;;  %788 = vmatpush.bf16.msra.mxu3 %v765_v5  ;;  %v768_v37 = vld [vmem:[#allocation2 + $0x8] sm:$0xff]  ;;  %v767_v38 = vld [vmem:[#allocation2] sm:$0xff] }
  0x1d   : > { %v322_v2 = vld [vmem:[%s310_s8] sm:$0xff]  ;;  %v323_v3 = vld [vmem:[%s310_s8 + $0x8] sm:$0xff]  ;;  %v324_v8 = vld [vmem:[%s310_s8 + $0x10] sm:$0xff] }
  0x1e   : > { %v326_v6 = vpack.c.bf16 %v323_v3, %v322_v2  ;;  %v325_v9 = vld [vmem:[%s310_s8 + $0x18] sm:$0xff]  ;;  %796 = vmatpush.bf16.msra.mxu2 %v773_v20  ;;  %v857_v40 = vld [vmem:[%s1200_s4] ss:$0 sm:$0xff]  ;;  %s1136_s8 = scalar_lea.sflag [#allocation4], %s299_s29 }
  0x1f   : > { %v327_v10 = vpack.c.bf16 %v325_v9, %v324_v8  ;;  %541 = vmatpush.bf16.msrb.mxu0 %v774_v18  ;;  %v858_v55 = vld [vmem:[%s1202_s6] ss:$0 sm:$0xff] }
  0x20   : > { %682 = vmatmul.msk.bf16.vlgmr.msra.gmra.mxu0 %vm348_vm0, %v326_v6  ;;  %450 = vmatpush.bf16.msra.mxu1 %v764_v7 }
  0x21   : > { %789 = vmatpush.bf16.msra.mxu3 %v764_v7 }
  0x22   : > { %797 = vmatpush.bf16.msra.mxu2 %v772_v23 }
  0x23   : > { %542 = vmatpush.bf16.msrb.mxu0 %v773_v20 }
  0x24   : > { %451 = vmatpush.bf16.msra.mxu1 %v763_v11 }
  0x25   : > { %790 = vmatpush.bf16.msra.mxu3 %v763_v11 }
  0x26   : > { %798 = vmatpush.bf16.msra.mxu2 %v771_v34 }
  0x27   : > { %543 = vmatpush.bf16.msrb.mxu0 %v772_v23 }
  0x28   : > { %452 = vmatpush.bf16.msra.mxu1 %v762_v12 }
  0x29   : > { %791 = vmatpush.bf16.msra.mxu3 %v762_v12 }
  0x2a   : > { %799 = vmatpush.bf16.msra.mxu2 %v770_v35 }
  0x2b   : > { %544 = vmatpush.bf16.msrb.mxu0 %v771_v34 }
  0x2c   : > { %453 = vmatpush.bf16.msra.mxu1 %v761_v13 }
  0x2d   : > { %792 = vmatpush.bf16.msra.mxu3 %v761_v13 }
  0x2e   : > { %800 = vmatpush.bf16.msra.mxu2 %v769_v36 }
  0x2f   : > { %545 = vmatpush.bf16.msrb.mxu0 %v770_v35 }
  0x30   : > { %683 = vmatmul.msk.bf16.gmra.mxu0 %vm348_vm0, %v327_v10  ;;  %454 = vmatpush.bf16.msra.mxu1 %v760_v14 }
  0x31   : > { %793 = vmatpush.bf16.msra.mxu3 %v760_v14 }
  0x32   : > { %801 = vmatpush.bf16.msra.mxu2 %v768_v37 }
  0x33   : > { %546 = vmatpush.bf16.msrb.mxu0 %v769_v36 }
  0x34   : > { %455 = vmatpush.bf16.msra.mxu1 %v759_v15 }
  0x35   : > { %794 = vmatpush.bf16.msra.mxu3 %v759_v15 }
  0x36   : > { %802 = vmatpush.bf16.msra.mxu2 %v767_v38 }
  0x37   : > { %547 = vmatpush.bf16.msrb.mxu0 %v768_v37 }
  0x3b   : > { %548 = vmatpush.bf16.msrb.mxu0 %v767_v38 }
  0x9d   : > { %v364_v16 = vpop.f32.mrf.mxu0 }
  0x9e   : > { %v365_v19 = vadd.f32 %v856_v17, %v364_v16 }
  0xa0   : > { %859 = vtanh.f32 %v365_v19 }
  0xa5   : > { %v366_v21 = vpop.f32.mrf.mxu0 }
  0xa6   : > { %v367_v22 = vadd.f32 %v856_v17, %v366_v21  ;;  %v860_v24 = vpop.eup %859 }
  0xa8   : > { %861 = vtanh.f32 %v367_v22 }
  0xad   : > { %v369_v25 = vpop.f32.mrf.mxu0 }
  0xae   : > { %v862_v26 = vpop.eup %861  ;;  %v370_v28 = vadd.f32 %v856_v17, %v369_v25 }
  0xaf   : > { %v378_v27 = vpack.c.bf16 %v862_v26, %v860_v24 }
  0xb0   : > { %863 = vtanh.f32 %v370_v28 }
  0xb1   : > { %456 = vmatmul.bf16.vlgmr.msra.gmra.mxu1 %v378_v27 }
  0xb5   : > { %v371_v29 = vpop.f32.mrf.mxu0 }
  0xb6   : > { %v372_v30 = vadd.f32 %v856_v17, %v371_v29  ;;  %v864_v31 = vpop.eup %863 }
  0xb8   : > { %865 = vtanh.f32 %v372_v30 }
  0xbe   : > { %v866_v32 = vpop.eup %865 }
  0xbf   : > { %v379_v33 = vpack.c.bf16 %v866_v32, %v864_v31 }
  0xc1   : > { %461 = vmatmul.bf16.vlgmr.msra.gmra.mxu3 %v379_v33 }
 0x12e   : > { %v457_v39 = vpop.f32.mrf.mxu1 }
 0x12f   : > { %v458_v41 = vadd.f32 %v857_v40, %v457_v39 }
 0x131   : > { %867 = vtanh.f32 %v458_v41 }
 0x136   : > { %v459_v42 = vpop.f32.mrf.mxu1 }
 0x137   : > { %v460_v43 = vadd.f32 %v857_v40, %v459_v42  ;;  %v868_v44 = vpop.eup %867 }
 0x139   : > { %869 = vtanh.f32 %v460_v43 }
 0x13f   : > { %v870_v45 = vpop.eup %869 }
 0x140   : > { %v471_v46 = vpack.c.bf16 %v870_v45, %v868_v44 }
 0x142   : > { %549 = vmatmul.bf16.vlgmr.msrb.gmra.mxu0 %v471_v46 }
 0x144   : > { %v462_v47 = vpop.f32.mrf.mxu3 }
 0x145   : > { %v463_v48 = vadd.f32 %v857_v40, %v462_v47 }
 0x147   : > { %871 = vtanh.f32 %v463_v48 }
 0x14c   : > { %v464_v49 = vpop.f32.mrf.mxu3 }
 0x14d   : > { %v465_v50 = vadd.f32 %v857_v40, %v464_v49  ;;  %v872_v51 = vpop.eup %871 }
 0x14f   : > { %873 = vtanh.f32 %v465_v50 }
 0x155   : > { %v874_v52 = vpop.eup %873 }
 0x156   : > { %v472_v53 = vpack.c.bf16 %v874_v52, %v872_v51 }
 0x158   : > { %554 = vmatmul.bf16.vlgmr.msra.gmra.mxu2 %v472_v53 }
 0x1bf   : > { %v550_v54 = vpop.f32.mrf.mxu0 }
 0x1c0   : > { %v551_v57 = vadd.f32 %v858_v55, %v550_v54 }
 0x1c7   : > { %v552_v56 = vpop.f32.mrf.mxu0 }
 0x1c8   : > { %v553_v58 = vadd.f32 %v858_v55, %v552_v56 }
 0x1ca   : > { %v779_v59 = vpack.c.bf16 %v553_v58, %v551_v57 }
 0x1cc   : > { %780 = vst [vmem:[%s301_s15] sm:$0xff] %v779_v59  }
 0x1db   : > { %v555_v60 = vpop.f32.mrf.mxu2 }
 0x1dc   : > { %v556_v62 = vadd.f32 %v858_v55, %v555_v60 }
 0x1e3   : > { %v557_v61 = vpop.f32.mrf.mxu2 }
 0x1e4   : > { %v558_v63 = vadd.f32 %v858_v55, %v557_v61  ;;  %575 = sbr.rel (!%p1068_p5) target bundleno = 521 (0x209), region = 56 }
 0x1e6   : > { %v784_v0 = vpack.c.bf16 %v558_v63, %v556_v62 }
 0x1e8   : > { %786 = vst [vmem:[%s301_s15 + $0x8] sm:$0xff] %v784_v0  }
 0x1e9   : > { %s1214_s16 = smov (!%p578_p0, %s577_s16), 4 }
 0x1ea   : > { %s750_s17 = sshll.u32 %s1214_s16, 2 }
 0x1eb   : > { %s581_s18 = ssub.s32 16, %s750_s17 }
 0x1ec   : > { %s582_s19 = sshll.u32 %s581_s18, 4 }
 0x1ed   : > { %583 = vsyncadd %s1136_s8, %s582_s19  ;;  %p1145_p1 = scmp.ne.s32.totalorder %s750_s17, 0  ;;  %s775_s11 = sshll.u32 %s1051_s28, 4 }
 0x1ee   : > { %s586_s20 = scalar_lea.hbm %s1203_s7, %s775_s11  ;;  %s588_s29 = sshll.u32 %s301_s15, 4  ;;  %s1153_s29 = int_to_ptr.vmem [resolvable:$true] %s588_s29 }
 0x1ef   : > { %s590_s9 = sshll.u32 %s586_s20, 4  ;;  %s1204_s13 = sshll.u32 %s1214_s16, 6  ;;  %s1155_s9 = int_to_ptr.hbm [resolvable:$true] %s590_s9 }
 0x1f0   : > { %s905_s14 = sshra.s32 %s1153_s29, 4  ;;  %s907_s17 = sshrl.u32 %s1204_s13, 4  ;;  %s906_s14 = int_to_ptr.vmem [resolvable:$true] %s905_s14 }
 0x1f1   : > { %s912_s18 = scalar_lea.vmem %s906_s14, %s907_s17  ;;  %s987_s28 = smov [#allocation5]  }
 0x1f2   : > { %p913_p2 = scmp.ne.s32.totalorder %s906_s14, %s912_s18  ;;  %s916_s19 = scalar_lea.vmem %s987_s28, 32 }
 0x1f3   : > { %p918_p5 = scmp.lt.s32.totalorder %s916_s19, %s912_s18 }
 0x1f4   : > { %p914_p3 = pnand %p913_p2, %p1145_p1 }
 0x1f6   : > { %p915_p4 = pneg %p914_p3 }
 0x1f8   : > { %p920_p7 = pnand %p918_p5, %p915_p4 }
 0x1fa   : > { %923 = shalt.err (!%p920_p7)
}
 0x1fb   : > { %s924_s15 = sshra.s32 %s1155_s9, 4  ;;  %s935_s20 = scalar_lea.hbm %s1203_s7, 24  ;;  %s925_s15 = int_to_ptr.hbm [resolvable:$true] %s924_s15 }
 0x1fc   : > { %s931_s11 = scalar_lea.hbm %s925_s15, %s907_s17  ;;  %p936_p11 = scmp.lt.s32.totalorder %s925_s15, %s1203_s7 }
 0x1fd   : > { %p932_p8 = scmp.ne.s32.totalorder %s925_s15, %s931_s11  ;;  %p937_p12 = scmp.lt.s32.totalorder %s935_s20, %s931_s11 }
 0x1ff   : > { %p933_p9 = pnand %p932_p8, %p1145_p1  ;;  %p938_p13 = por %p937_p12, %p936_p11 }
 0x201   : > { %p934_p10 = pneg %p933_p9 }
 0x203   : > { %p939_p0 = pnand %p938_p13, %p934_p10 }
 0x205   : > { %942 = shalt.err (!%p939_p0)
}
 0x206   : > { %s988_s18 = smov 64   ;;  %s989_s17 = smov 4  }
 0x207   : > { %s1208_s28 = sshll.u32 %s1214_s16, 6 }
 0x208   : > { %596 = dma.vmem_to_hbm [thread:$0]  (%p1145_p1), %s1153_s29, %s1208_s28, %s1155_s9, %s1136_s8, %s988_s18, %s988_s18, %s989_s17  }
 0x209 PF: > { %p818_p2 = scmp.ge.s32.totalorder %s982_s27, 2  ;;  %s605_s13 = sand.u32 1, %s970_s24  }
 0x20a   : > { %s606_s19 = scalar_lea.sflag [#allocation4], %s605_s13 }
 0x20b   : > { %p813_p3 = pnand %p818_p2, %p1072_p6 }
 0x20d   : > { %p814_p4 = pneg %p813_p3 }
 0x20f   : > { %965 = dma.done.wait (%p814_p4), %s606_s19, 256  }
 0x210   : > { %967 = vsyncadd (%p814_p4), %s606_s19, 4294967040  ;;  %p18_p5 = scmp.ge.s32.totalorder %s1055_s30, 4   ;;  %s1209_s24 = smov %s974_s25 }
 0x211   : > { %s1210_s25 = smov %s978_s26  ;;  %s1211_s26 = smov %s1066_s10 }
 0x212   : > { %s1212_s27 = smov %s1055_s30  ;;  %20 = sbr.rel (!%p18_p5) target bundleno = 4 (0x4), region = 88 }
 0x217   :  { %612 = vsyncpa [#allocation3], 1 }
 0x218   :  { %614 = vsyncpa [#allocation3 + $0x1], 1 }
 0x219   :  { %615 = vsyncpa [#allocation4], 1 }
 0x21a   :  { %617 = vsyncpa [#allocation4 + $0x1], 1 }

// kernel: tpu_custom_call.1
= control target key start
LH: loop header
LB: loop body
LE: loop exit
PB: predicated region body
PF: predicated region fallthrough
CT: control target
= control target key end

     0   :  { %12 = vsyncpa [#allocation3], 0  ;;  %s1196_s0 = inlined_call_operand.vmem [shape: f32[48,32], index: 0, kind: input, shape index: {}]   ;;  %s1197_s1 = inlined_call_operand.vmem [shape: bf16[32,128], index: 1, kind: input, shape index: {}]   ;;  %s1198_s2 = inlined_call_operand.vmem [shape: f32[1,128], index: 2, kind: input, shape index: {}]   ;;  %s1199_s3 = inlined_call_operand.vmem [shape: bf16[128,128], index: 3, kind: input, shape index: {}]   ;;  %s1200_s4 = inlined_call_operand.vmem [shape: f32[1,128], index: 4, kind: input, shape index: {}]   ;;  %s1201_s5 = inlined_call_operand.hbm [shape: bf16[128,128], index: 5, kind: input, shape index: {}]   ;;  %s1202_s6 = inlined_call_operand.vmem [shape: f32[1,128], index: 6, kind: input, shape index: {}]   ;;  %s1203_s7 = inlined_call_operand.hbm [shape: bf16[48,128], index: 7, kind: output, shape index: {}]  }
   0x1   :  { %13 = vsyncpa [#allocation4], 0 }
   0x2   :  { %15 = vsyncpa [#allocation4 + $0x1], 0  ;;  %s1030_s24 = smov 0   ;;  %s1032_s25 = smov 0  }
   0x3   :  { %s1034_s26 = smov 0   ;;  %s1036_s27 = smov 0  }
   0x4 LB: > { %s1051_s28 = sadd.s32 4294967295, %s982_s27   ;;  %s665_s29 = sadd.s32 4294967294, %s982_s27   ;;  %s982_s27 = sphi %s1036_s27, %s1212_s27   ;;  %s978_s26 = sphi %s1034_s26, %s1211_s26   ;;  %s974_s25 = sphi %s1032_s25, %s1210_s25   ;;  %s970_s24 = sphi %s1030_s24, %s1209_s24  }
   0x5   : > { %s1055_s30 = sadd.s32 1, %s982_s27   ;;  %s180_s8 = sadd.s32 1, %s978_s26 }
   0x6   : > { %s177_s9 = ssub.s32 %s982_s27, %s1055_s30  ;;  %p190_p0 = scmp.ne.s32.totalorder %s978_s26, %s974_s25 }
   0x7   : > { %p178_p1 = scmp.eq.s32.totalorder %s177_s9, 0  ;;  %p191_p2 = scmp.eq.s32.totalorder %s1051_s28, 1 }
   0x8   : > { %p196_p3 = scmp.ne.s32.totalorder %s974_s25, %s970_s24  ;;  %p197_p4 = scmp.eq.s32.totalorder %s665_s29, 1 }
   0x9   : > { %s1066_s10 = scalar_select %p178_p1, %s978_s26, %s180_s8  }
   0xa   : > { %p1068_p5 = por %p191_p2, %p190_p0  ;;  %p1072_p6 = por %p197_p4, %p196_p3 }
   0xb   : > { %p666_p7 = scmp.ge.s32.totalorder %s982_s27, 1  ;;  %p204_p8 = scmp.lt.s32.totalorder %s982_s27, 3 }
   0xc   : > { %p816_p9 = scmp.eq.s32.totalorder %s1051_s28, 0  ;;  %s227_s15 = sshll.u32 %s1201_s5, 4  ;;  %s228_s15 = int_to_ptr.hbm [resolvable:$true] %s227_s15 }
   0xd   : > { %p205_p10 = pnand %p666_p7, %p204_p8  ;;  %s984_s16 = smov [#allocation2]  }
   0xe   : > { %s229_s17 = sshll.u32 %s984_s16, 4  ;;  %s985_s18 = smov 64   ;;  %s230_s17 = int_to_ptr.vmem [resolvable:$true] %s229_s17 }
   0xf   : > { %p808_p11 = pneg %p205_p10  ;;  %s986_s19 = smov 4  }
  0x10   : > { %265 = sbr.rel (%p205_p10) target bundleno = 521 (0x209), region = 48 }
  0x11   : > { %p809_p12 = pnand %p816_p9, %p808_p11 }
  0x13   : > { %811 = dma.hbm_to_vmem [thread:$0]  (!%p809_p12), %s228_s15, 1024, %s230_s17, [#allocation3], %s985_s18, %s985_s18, %s986_s19  }
  0x15   : > { %961 = dma.done.wait (%p816_p9), [#allocation3], 1024  }
  0x16   : > { %963 = vsyncadd (%p816_p9), [#allocation3], 4294966272  ;;  %s1089_s20 = sshll.u32 %s1051_s28, 2  ;;  %v758_v0 = vld [vmem:[%s1197_s1 + $0x8] sm:$0xff]  ;;  %v757_v1 = vld [vmem:[%s1197_s1] sm:$0xff]  ;;  %vm348_vm0 = vcmask 261120  }
  0x17   : > { %p307_p13 = scmp.lt.s32.totalorder %s1089_s20, 5  ;;  %361 = vmatpush.bf16.msra.mxu0 %v758_v0  ;;  %v766_v4 = vld [vmem:[%s1199_s3 + $0x38] sm:$0xff]  ;;  %v765_v5 = vld [vmem:[%s1199_s3 + $0x30] sm:$0xff]  ;;  %v764_v7 = vld [vmem:[%s1199_s3 + $0x28] sm:$0xff]  ;;  %s299_s29 = sand.u32 1, %s974_s25  }
  0x18   : > { %448 = vmatpush.bf16.msra.mxu1 %v766_v4  ;;  %787 = vmatpush.bf16.msra.mxu3 %v766_v4  ;;  %v763_v11 = vld [vmem:[%s1199_s3 + $0x20] sm:$0xff]  ;;  %v762_v12 = vld [vmem:[%s1199_s3 + $0x18] sm:$0xff]  ;;  %v761_v13 = vld [vmem:[%s1199_s3 + $0x10] sm:$0xff]  ;;  %s671_s14 = sshll.u32 %s299_s29, 4  ;;  %s577_s16 = ssub.s32 (%p1068_p5), 6, %s1089_s20 }
  0x19   : > { %s308_s21 = scalar_select %p307_p13, %s1089_s20, 5  ;;  %v760_v14 = vld [vmem:[%s1199_s3 + $0x8] sm:$0xff]  ;;  %v759_v15 = vld [vmem:[%s1199_s3] sm:$0xff]  ;;  %v774_v18 = vld [vmem:[#allocation2 + $0x38] sm:$0xff] }
  0x1a   : > { %v856_v17 = vld [vmem:[%s1198_s2] ss:$0 sm:$0xff]  ;;  %v773_v20 = vld [vmem:[#allocation2 + $0x30] sm:$0xff]  ;;  %795 = vmatpush.bf16.msra.mxu2 %v774_v18  ;;  %v772_v23 = vld [vmem:[#allocation2 + $0x28] sm:$0xff]  ;;  %s301_s15 = scalar_lea.vmem [#allocation5], %s671_s14  ;;  %p578_p0 = scmp.lt.s32.totalorder (%p1068_p5), %s577_s16, 4 }
  0x1b   : > { %s673_s22 = sshll.u32 %s308_s21, 3  ;;  %362 = vmatpush.bf16.msra.mxu0 %v757_v1  ;;  %v771_v34 = vld [vmem:[#allocation2 + $0x20] sm:$0xff]  ;;  %v770_v35 = vld [vmem:[#allocation2 + $0x18] sm:$0xff]  ;;  %v769_v36 = vld [vmem:[#allocation2 + $0x10] sm:$0xff] }
  0x1c   : > { %s310_s8 = scalar_lea.vmem %s1196_s0, %s673_s22  ;;  %449 = vmatpush.bf16.msra.mxu1 %v765_v5  ;;  %788 = vmatpush.bf16.msra.mxu3 %v765_v5  ;;  %v768_v37 = vld [vmem:[#allocation2 + $0x8] sm:$0xff]  ;;  %v767_v38 = vld [vmem:[#allocation2] sm:$0xff] }
  0x1d   : > { %v322_v2 = vld [vmem:[%s310_s8] sm:$0xff]  ;;  %v323_v3 = vld [vmem:[%s310_s8 + $0x8] sm:$0xff]  ;;  %v324_v8 = vld [vmem:[%s310_s8 + $0x10] sm:$0xff] }
  0x1e   : > { %v326_v6 = vpack.c.bf16 %v323_v3, %v322_v2  ;;  %v325_v9 = vld [vmem:[%s310_s8 + $0x18] sm:$0xff]  ;;  %796 = vmatpush.bf16.msra.mxu2 %v773_v20  ;;  %v857_v40 = vld [vmem:[%s1200_s4] ss:$0 sm:$0xff]  ;;  %s1136_s8 = scalar_lea.sflag [#allocation4], %s299_s29 }
  0x1f   : > { %v327_v10 = vpack.c.bf16 %v325_v9, %v324_v8  ;;  %541 = vmatpush.bf16.msrb.mxu0 %v774_v18  ;;  %v858_v55 = vld [vmem:[%s1202_s6] ss:$0 sm:$0xff] }
  0x20   : > { %682 = vmatmul.msk.bf16.vlgmr.msra.gmra.mxu0 %vm348_vm0, %v326_v6  ;;  %450 = vmatpush.bf16.msra.mxu1 %v764_v7 }
  0x21   : > { %789 = vmatpush.bf16.msra.mxu3 %v764_v7 }
  0x22   : > { %797 = vmatpush.bf16.msra.mxu2 %v772_v23 }
  0x23   : > { %542 = vmatpush.bf16.msrb.mxu0 %v773_v20 }
  0x24   : > { %451 = vmatpush.bf16.msra.mxu1 %v763_v11 }
  0x25   : > { %790 = vmatpush.bf16.msra.mxu3 %v763_v11 }
  0x26   : > { %798 = vmatpush.bf16.msra.mxu2 %v771_v34 }
  0x27   : > { %543 = vmatpush.bf16.msrb.mxu0 %v772_v23 }
  0x28   : > { %452 = vmatpush.bf16.msra.mxu1 %v762_v12 }
  0x29   : > { %791 = vmatpush.bf16.msra.mxu3 %v762_v12 }
  0x2a   : > { %799 = vmatpush.bf16.msra.mxu2 %v770_v35 }
  0x2b   : > { %544 = vmatpush.bf16.msrb.mxu0 %v771_v34 }
  0x2c   : > { %453 = vmatpush.bf16.msra.mxu1 %v761_v13 }
  0x2d   : > { %792 = vmatpush.bf16.msra.mxu3 %v761_v13 }
  0x2e   : > { %800 = vmatpush.bf16.msra.mxu2 %v769_v36 }
  0x2f   : > { %545 = vmatpush.bf16.msrb.mxu0 %v770_v35 }
  0x30   : > { %683 = vmatmul.msk.bf16.gmra.mxu0 %vm348_vm0, %v327_v10  ;;  %454 = vmatpush.bf16.msra.mxu1 %v760_v14 }
  0x31   : > { %793 = vmatpush.bf16.msra.mxu3 %v760_v14 }
  0x32   : > { %801 = vmatpush.bf16.msra.mxu2 %v768_v37 }
  0x33   : > { %546 = vmatpush.bf16.msrb.mxu0 %v769_v36 }
  0x34   : > { %455 = vmatpush.bf16.msra.mxu1 %v759_v15 }
  0x35   : > { %794 = vmatpush.bf16.msra.mxu3 %v759_v15 }
  0x36   : > { %802 = vmatpush.bf16.msra.mxu2 %v767_v38 }
  0x37   : > { %547 = vmatpush.bf16.msrb.mxu0 %v768_v37 }
  0x3b   : > { %548 = vmatpush.bf16.msrb.mxu0 %v767_v38 }
  0x9d   : > { %v364_v16 = vpop.f32.mrf.mxu0 }
  0x9e   : > { %v365_v19 = vadd.f32 %v856_v17, %v364_v16 }
  0xa0   : > { %859 = vtanh.f32 %v365_v19 }
  0xa5   : > { %v366_v21 = vpop.f32.mrf.mxu0 }
  0xa6   : > { %v367_v22 = vadd.f32 %v856_v17, %v366_v21  ;;  %v860_v24 = vpop.eup %859 }
  0xa8   : > { %861 = vtanh.f32 %v367_v22 }
  0xad   : > { %v369_v25 = vpop.f32.mrf.mxu0 }
  0xae   : > { %v862_v26 = vpop.eup %861  ;;  %v370_v28 = vadd.f32 %v856_v17, %v369_v25 }
  0xaf   : > { %v378_v27 = vpack.c.bf16 %v862_v26, %v860_v24 }
  0xb0   : > { %863 = vtanh.f32 %v370_v28 }
  0xb1   : > { %456 = vmatmul.bf16.vlgmr.msra.gmra.mxu1 %v378_v27 }
  0xb5   : > { %v371_v29 = vpop.f32.mrf.mxu0 }
  0xb6   : > { %v372_v30 = vadd.f32 %v856_v17, %v371_v29  ;;  %v864_v31 = vpop.eup %863 }
  0xb8   : > { %865 = vtanh.f32 %v372_v30 }
  0xbe   : > { %v866_v32 = vpop.eup %865 }
  0xbf   : > { %v379_v33 = vpack.c.bf16 %v866_v32, %v864_v31 }
  0xc1   : > { %461 = vmatmul.bf16.vlgmr.msra.gmra.mxu3 %v379_v33 }
 0x12e   : > { %v457_v39 = vpop.f32.mrf.mxu1 }
 0x12f   : > { %v458_v41 = vadd.f32 %v857_v40, %v457_v39 }
 0x131   : > { %867 = vtanh.f32 %v458_v41 }
 0x136   : > { %v459_v42 = vpop.f32.mrf.mxu1 }
 0x137   : > { %v460_v43 = vadd.f32 %v857_v40, %v459_v42  ;;  %v868_v44 = vpop.eup %867 }
 0x139   : > { %869 = vtanh.f32 %v460_v43 }
 0x13f   : > { %v870_v45 = vpop.eup %869 }
 0x140   : > { %v471_v46 = vpack.c.bf16 %v870_v45, %v868_v44 }
 0x142   : > { %549 = vmatmul.bf16.vlgmr.msrb.gmra.mxu0 %v471_v46 }
 0x144   : > { %v462_v47 = vpop.f32.mrf.mxu3 }
 0x145   : > { %v463_v48 = vadd.f32 %v857_v40, %v462_v47 }
 0x147   : > { %871 = vtanh.f32 %v463_v48 }
 0x14c   : > { %v464_v49 = vpop.f32.mrf.mxu3 }
 0x14d   : > { %v465_v50 = vadd.f32 %v857_v40, %v464_v49  ;;  %v872_v51 = vpop.eup %871 }
 0x14f   : > { %873 = vtanh.f32 %v465_v50 }
 0x155   : > { %v874_v52 = vpop.eup %873 }
 0x156   : > { %v472_v53 = vpack.c.bf16 %v874_v52, %v872_v51 }
 0x158   : > { %554 = vmatmul.bf16.vlgmr.msra.gmra.mxu2 %v472_v53 }
 0x1bf   : > { %v550_v54 = vpop.f32.mrf.mxu0 }
 0x1c0   : > { %v551_v57 = vadd.f32 %v858_v55, %v550_v54 }
 0x1c7   : > { %v552_v56 = vpop.f32.mrf.mxu0 }
 0x1c8   : > { %v553_v58 = vadd.f32 %v858_v55, %v552_v56 }
 0x1ca   : > { %v779_v59 = vpack.c.bf16 %v553_v58, %v551_v57 }
 0x1cc   : > { %780 = vst [vmem:[%s301_s15] sm:$0xff] %v779_v59  }
 0x1db   : > { %v555_v60 = vpop.f32.mrf.mxu2 }
 0x1dc   : > { %v556_v62 = vadd.f32 %v858_v55, %v555_v60 }
 0x1e3   : > { %v557_v61 = vpop.f32.mrf.mxu2 }
 0x1e4   : > { %v558_v63 = vadd.f32 %v858_v55, %v557_v61  ;;  %575 = sbr.rel (!%p1068_p5) target bundleno = 521 (0x209), region = 56 }
 0x1e6   : > { %v784_v0 = vpack.c.bf16 %v558_v63, %v556_v62 }
 0x1e8   : > { %786 = vst [vmem:[%s301_s15 + $0x8] sm:$0xff] %v784_v0  }
 0x1e9   : > { %s1214_s16 = smov (!%p578_p0, %s577_s16), 4 }
 0x1ea   : > { %s750_s17 = sshll.u32 %s1214_s16, 2 }
 0x1eb   : > { %s581_s18 = ssub.s32 16, %s750_s17 }
 0x1ec   : > { %s582_s19 = sshll.u32 %s581_s18, 4 }
 0x1ed   : > { %583 = vsyncadd %s1136_s8, %s582_s19  ;;  %p1145_p1 = scmp.ne.s32.totalorder %s750_s17, 0  ;;  %s775_s11 = sshll.u32 %s1051_s28, 4 }
 0x1ee   : > { %s586_s20 = scalar_lea.hbm %s1203_s7, %s775_s11  ;;  %s588_s29 = sshll.u32 %s301_s15, 4  ;;  %s1153_s29 = int_to_ptr.vmem [resolvable:$true] %s588_s29 }
 0x1ef   : > { %s590_s9 = sshll.u32 %s586_s20, 4  ;;  %s1204_s13 = sshll.u32 %s1214_s16, 6  ;;  %s1155_s9 = int_to_ptr.hbm [resolvable:$true] %s590_s9 }
 0x1f0   : > { %s905_s14 = sshra.s32 %s1153_s29, 4  ;;  %s907_s17 = sshrl.u32 %s1204_s13, 4  ;;  %s906_s14 = int_to_ptr.vmem [resolvable:$true] %s905_s14 }
 0x1f1   : > { %s912_s18 = scalar_lea.vmem %s906_s14, %s907_s17  ;;  %s987_s28 = smov [#allocation5]  }
 0x1f2   : > { %p913_p2 = scmp.ne.s32.totalorder %s906_s14, %s912_s18  ;;  %s916_s19 = scalar_lea.vmem %s987_s28, 32 }
 0x1f3   : > { %p918_p5 = scmp.lt.s32.totalorder %s916_s19, %s912_s18 }
 0x1f4   : > { %p914_p3 = pnand %p913_p2, %p1145_p1 }
 0x1f6   : > { %p915_p4 = pneg %p914_p3 }
 0x1f8   : > { %p920_p7 = pnand %p918_p5, %p915_p4 }
 0x1fa   : > { %923 = shalt.err (!%p920_p7)
}
 0x1fb   : > { %s924_s15 = sshra.s32 %s1155_s9, 4  ;;  %s935_s20 = scalar_lea.hbm %s1203_s7, 24  ;;  %s925_s15 = int_to_ptr.hbm [resolvable:$true] %s924_s15 }
 0x1fc   : > { %s931_s11 = scalar_lea.hbm %s925_s15, %s907_s17  ;;  %p936_p11 = scmp.lt.s32.totalorder %s925_s15, %s1203_s7 }
 0x1fd   : > { %p932_p8 = scmp.ne.s32.totalorder %s925_s15, %s931_s11  ;;  %p937_p12 = scmp.lt.s32.totalorder %s935_s20, %s931_s11 }
 0x1ff   : > { %p933_p9 = pnand %p932_p8, %p1145_p1  ;;  %p938_p13 = por %p937_p12, %p936_p11 }
 0x201   : > { %p934_p10 = pneg %p933_p9 }
 0x203   : > { %p939_p0 = pnand %p938_p13, %p934_p10 }
 0x205   : > { %942 = shalt.err (!%p939_p0)
}
 0x206   : > { %s988_s18 = smov 64   ;;  %s989_s17 = smov 4  }
 0x207   : > { %s1208_s28 = sshll.u32 %s1214_s16, 6 }
 0x208   : > { %596 = dma.vmem_to_hbm [thread:$0]  (%p1145_p1), %s1153_s29, %s1208_s28, %s1155_s9, %s1136_s8, %s988_s18, %s988_s18, %s989_s17  }
 0x209 PF: > { %p818_p2 = scmp.ge.s32.totalorder %s982_s27, 2  ;;  %s605_s13 = sand.u32 1, %s970_s24  }
 0x20a   : > { %s606_s19 = scalar_lea.sflag [#allocation4], %s605_s13 }
 0x20b   : > { %p813_p3 = pnand %p818_p2, %p1072_p6 }
 0x20d   : > { %p814_p4 = pneg %p813_p3 }
 0x20f   : > { %965 = dma.done.wait (%p814_p4), %s606_s19, 256  }
 0x210   : > { %967 = vsyncadd (%p814_p4), %s606_s19, 4294967040  ;;  %p18_p5 = scmp.ge.s32.totalorder %s1055_s30, 4   ;;  %s1209_s24 = smov %s974_s25 }
 0x211   : > { %s1210_s25 = smov %s978_s26  ;;  %s1211_s26 = smov %s1066_s10 }
 0x212   : > { %s1212_s27 = smov %s1055_s30  ;;  %20 = sbr.rel (!%p18_p5) target bundleno = 4 (0x4), region = 88 }
 0x217   :  { %612 = vsyncpa [#allocation3], 1 }
 0x218   :  { %614 = vsyncpa [#allocation3 + $0x1], 1 }
 0x219   :  { %615 = vsyncpa [#allocation4], 1 }
 0x21a   :  { %617 = vsyncpa [#allocation4 + $0x1], 1 }

</bundles_post_ra>
